<compile_context>
chip_gen: v7x
topology: tpu7x:2x2x1
jax: 0.10.0
libtpu: 0.0.40
codegen_flags: <defaults>
</compile_context>

<pallas_src>
import functools

import jax
import jax.numpy as jnp
from jax import lax
from jax.experimental import pallas as pl
from jax.experimental.pallas import tpu as pltpu


# -----------------------------------------------------------------------------
# Generation-aware VMEM budgets.
# -----------------------------------------------------------------------------
def _vmem_capacity_bytes() -> int:
    try:
        info = pltpu.get_tpu_info()
        cap = getattr(info, "vmem_capacity_bytes", None)
        if cap:
            return int(cap)
    except Exception:
        pass
    return 128 * 1024 * 1024  # v5e / v6e default


def _vmem_budgets():
    """Returns (per-buffer x-tile budget, scoped vmem limit) in bytes."""
    cap = _vmem_capacity_bytes()
    if cap <= 64 * 1024 * 1024:
        # v7x-class: only 64 MiB per TensorCore -> smaller tiles, modest limit.
        return 8 * 1024 * 1024, 48 * 1024 * 1024
    # v5e / v6e: 128 MiB physical -> bigger tiles (fewer per-step overheads).
    return 16 * 1024 * 1024, 96 * 1024 * 1024


# -----------------------------------------------------------------------------
# Channel tile: only split channels when batch alone cannot feed both v7x
# TensorCores (harmless on single-TC v5e/v6e).  Ct must be a multiple of 8
# (sublane rule) or equal to C.
# -----------------------------------------------------------------------------
def _pick_channel_tile(c: int, n: int) -> int:
    if n >= 2:
        return c
    for ct in (256, 128, 64, 32, 16, 8):
        if c % ct == 0 and c // ct >= 2:
            return ct
    return c


# -----------------------------------------------------------------------------
# Spatial tile: largest multiple of 128 under the per-buffer budget, or the
# full extent when the whole row fits.  Budget counted at 4 B/elem so any f32
# temporaries (cast / masked select) created in-kernel stay inside the plan.
# -----------------------------------------------------------------------------
def _pick_spatial_tile(hw: int, ct: int, budget_bytes: int) -> int:
    bpe = 4
    if ct * hw * bpe <= budget_bytes:
        return hw                                   # single full-extent block
    ts = (budget_bytes // (ct * bpe)) // 128 * 128
    ts = max(ts, 128)
    if ts >= hw:
        return hw
    return ts


# -----------------------------------------------------------------------------
# Kernel 1: streaming global average (+ optional max) pool.
#   refs (add_max=False): x_ref (1,Ct,TS), avg_ref (1,Ct,1), sum_ref (Ct,1)
#   refs (add_max=True) : + mx_ref (1,Ct,1), max_ref (Ct,1)
# -----------------------------------------------------------------------------
def _pool_kernel(*refs, hw: int, ts: int, inv_hw: float,
                 add_max: bool, ragged: bool):
    if add_max:
        x_ref, avg_ref, mx_ref, sum_ref, max_ref = refs
    else:
        x_ref, avg_ref, sum_ref = refs
        mx_ref = max_ref = None

    s = pl.program_id(2)
    n_s = pl.num_programs(2)

    @pl.when(s == 0)
    def _init():
        sum_ref[...] = jnp.zeros_like(sum_ref)
        if add_max:
            max_ref[...] = jnp.full(max_ref.shape, -jnp.inf, max_ref.dtype)

    xt = x_ref[0]                                        # (Ct, TS), native dtype

    if ragged:
        # Mask the out-of-bounds tail of the last spatial tile (Pallas block
        # padding contents are unspecified): 0 for sum, -inf for max.
        valid = hw - s * ts
        lane = lax.broadcasted_iota(jnp.int32, (1, xt.shape[-1]), 1)
        inb = lane < valid                               # (1, TS), broadcasts
        x_sum = jnp.where(inb, xt, jnp.zeros_like(xt))
    else:
        x_sum = xt

    # f32 accumulation of the (native-dtype) tile; only the (Ct, 1) partials
    # ever live in f32 scratch.
    sum_ref[...] += jnp.sum(x_sum, axis=-1, keepdims=True, dtype=jnp.float32)

    if add_max:
        if ragged:
            x_max = jnp.where(inb, xt, jnp.full_like(xt, -jnp.inf))
        else:
            x_max = xt
        max_ref[...] = jnp.maximum(
            max_ref[...],
            jnp.max(x_max, axis=-1, keepdims=True).astype(jnp.float32))

    @pl.when(s == n_s - 1)
    def _finalize():
        avg_ref[...] = (sum_ref[...] * inv_hw)[None].astype(avg_ref.dtype)
        if add_max:
            mx_ref[...] = max_ref[...][None].astype(mx_ref.dtype)


# -----------------------------------------------------------------------------
# Kernel 2: excitation — sigmoid(relu(pooled @ W1^T) @ W2^T), batched over N,
# lane-dense (N, C), pre-transposed weights.  Single invocation (no grid).
# -----------------------------------------------------------------------------
def _excite_kernel(*refs, add_max: bool):
    if add_max:
        avg_ref, mx_ref, w1t_ref, w2t_ref, o_ref = refs
    else:
        avg_ref, w1t_ref, w2t_ref, o_ref = refs
        mx_ref = None

    w1t = w1t_ref[...].astype(jnp.float32)               # (C, Cr)
    w2t = w2t_ref[...].astype(jnp.float32)               # (Cr, C)

    def fc(v):                                            # v: (N, C) f32
        h = jnp.maximum(
            jnp.dot(v, w1t, preferred_element_type=jnp.float32), 0.0)
        return jnp.dot(h, w2t, preferred_element_type=jnp.float32)

    logits = fc(avg_ref[...].astype(jnp.float32))
    if add_max:
        logits = logits + fc(mx_ref[...].astype(jnp.float32))
    o_ref[...] = jax.nn.sigmoid(logits).astype(o_ref.dtype)


# -----------------------------------------------------------------------------
# Wrapper.
#   x  : (N, C, H, W)
#   w1 : (C//r, C)   -- Conv2d(C, C//r, 1, bias=False).weight squeezed
#   w2 : (C, C//r)   -- Conv2d(C//r, C, 1, bias=False).weight squeezed
# returns (N, C, 1, 1)
# -----------------------------------------------------------------------------
def channel_attention_forward(x, w1, w2, add_max: bool = False,
                              _force_spatial_tile=None):
    N, C, H, W = x.shape
    Cr = w1.shape[0]
    assert w1.shape == (Cr, C), "w1 expected as (C//r, C)"
    assert w2.shape == (C, Cr), "w2 expected as (C, C//r)"

    HW = H * W
    x2d = x.reshape(N, C, HW)                    # free reshape (NCHW contiguous)

    tile_budget, vmem_limit = _vmem_budgets()
    Ct = _pick_channel_tile(C, N)
    TS = (_force_spatial_tile if _force_spatial_tile is not None
          else _pick_spatial_tile(HW, Ct, tile_budget))
    S = pl.cdiv(HW, TS)
    ragged = (HW % TS) != 0

    pool_kernel = functools.partial(
        _pool_kernel, hw=HW, ts=TS, inv_hw=1.0 / HW,
        add_max=add_max, ragged=ragged)

    pooled_struct = jax.ShapeDtypeStruct((N, C, 1), jnp.float32)
    pooled_spec = pl.BlockSpec((1, Ct, 1), lambda n, c, s: (n, c, 0))
    out_shape = (pooled_struct, pooled_struct) if add_max else pooled_struct
    out_specs = (pooled_spec, pooled_spec) if add_max else pooled_spec
    scratch = [pltpu.VMEM((Ct, 1), jnp.float32)]          # running sum
    if add_max:
        scratch.append(pltpu.VMEM((Ct, 1), jnp.float32))  # running max

    pooled = pl.pallas_call(
        pool_kernel,
        out_shape=out_shape,
        grid_spec=pltpu.PrefetchScalarGridSpec(
            num_scalar_prefetch=0,
            grid=(N, C // Ct, S),                 # spatial reduction axis last
            in_specs=[pl.BlockSpec((1, Ct, TS), lambda n, c, s: (n, c, s))],
            out_specs=out_specs,
            scratch_shapes=scratch,
        ),
        compiler_params=pltpu.CompilerParams(
            dimension_semantics=("parallel", "parallel", "arbitrary"),
            vmem_limit_bytes=vmem_limit,
        ),
    )(x2d)

    if add_max:
        avg_p = pooled[0].reshape(N, C)           # free reshapes (drop unit dim)
        max_p = pooled[1].reshape(N, C)
    else:
        avg_p = pooled.reshape(N, C)

    # Tiny excitation in a second (single-invocation) pallas_call; everything
    # fits in VMEM as whole arrays.  Weights pre-transposed for row-vector
    # (N,C)@(C,Cr) / (N,Cr)@(Cr,C) lane-dense matmuls.
    w1t = jnp.transpose(w1)                       # (C, Cr)
    w2t = jnp.transpose(w2)                       # (Cr, C)
    excite_kernel = functools.partial(_excite_kernel, add_max=add_max)
    args = (avg_p, max_p, w1t, w2t) if add_max else (avg_p, w1t, w2t)

    attn = pl.pallas_call(
        excite_kernel,
        out_shape=jax.ShapeDtypeStruct((N, C), x.dtype),
    )(*args)

    return attn.reshape(N, C, 1, 1)


# -----------------------------------------------------------------------------
# Pure-JAX reference for checking.
# -----------------------------------------------------------------------------
def _ref_channel_attention(x, w1, w2, add_max: bool = False):
    def fc(v):                                    # v: (N, C)
        h = jnp.maximum(v @ w1.T, 0.0)            # (N, Cr)
        return h @ w2.T                           # (N, C)

    out = fc(jnp.mean(x, axis=(2, 3)))
    if add_max:
        out = out + fc(jnp.max(x, axis=(2, 3)))
    return jax.nn.sigmoid(out)[:, :, None, None]


if __name__ == "__main__":
    key = jax.random.PRNGKey(0)
    kx, k1, k2, kx2 = jax.random.split(key, 4)

    # Case 1: module defaults (add_max=False), evenly-tiled spatial extent.
    N, C, H, W = 2, 64, 16, 16
    reduction_ratio = 16
    Cr = C // reduction_ratio

    x = jax.random.normal(kx, (N, C, H, W), dtype=jnp.float32)
    w1 = jax.random.normal(k1, (Cr, C), dtype=jnp.float32) * 0.1
    w2 = jax.random.normal(k2, (C, Cr), dtype=jnp.float32) * 0.1

    out = jax.block_until_ready(
        channel_attention_forward(x, w1, w2, add_max=False))
    ref = _ref_channel_attention(x, w1, w2, add_max=False)
    assert out.shape == (N, C, 1, 1)
    assert jnp.allclose(out, ref, atol=1e-5, rtol=1e-4), "mismatch (avg path)"

    # Case 2: add_max=True, N=1 (exercises the channel-tile parallel axis) and
    # a forced small spatial tile so the ragged-tail masking path is exercised
    # (HW = 400, TS = 128 -> 4 tiles, last tile 16 valid lanes).
    x2 = jax.random.normal(kx2, (1, C, 20, 20), dtype=jnp.float32)
    out2 = jax.block_until_ready(
        channel_attention_forward(x2, w1, w2, add_max=True,
                                  _force_spatial_tile=128))
    ref2 = _ref_channel_attention(x2, w1, w2, add_max=True)
    assert jnp.allclose(out2, ref2, atol=1e-5, rtol=1e-4), "mismatch (avg+max, ragged)"

    print("KERNEL_OK")
</pallas_src>

<mosaic_0001>
module attributes {stable_mosaic.version = 11 : i64} {
  func.func @_pool_kernel(%arg0: i32, %arg1: i32, %arg2: i32, %arg3: memref<1x64x256xf32, #tpu.memory_space<vmem>>, %arg4: memref<1x64x1xf32, #tpu.memory_space<vmem>>, %arg5: memref<64x1xf32, #tpu.memory_space<vmem>>) attributes {dimension_semantics = [#tpu.dimension_semantics<parallel>, #tpu.dimension_semantics<parallel>, #tpu.dimension_semantics<arbitrary>], iteration_bounds = array<i64: 2, 1, 1>, scalar_prefetch = 0 : i64, scratch_operands = 1 : i64, tpu.core_type = #tpu.core_type<tc>, window_params = [{transform_indices = @transform_0, window_bounds = array<i64: 1, 64, 256>}, {transform_indices = @transform_1, window_bounds = array<i64: 1, 64, 1>}]} {
    %c0_i32 = arith.constant 0 : i32
    %0 = arith.cmpi eq, %arg2, %c0_i32 : i32
    %1 = arith.extui %0 : i1 to i32
    %c0_i32_0 = arith.constant 0 : i32
    %2 = arith.cmpi ne, %1, %c0_i32_0 : i32
    scf.if %2 {
      %cst_9 = arith.constant 0.000000e+00 : f32
      %13 = vector.broadcast %cst_9 : f32 to vector<64x1xf32>
      %c0_10 = arith.constant 0 : index
      %c0_11 = arith.constant 0 : index
      %14 = vector.load %arg5[%c0_10, %c0_11] : memref<64x1xf32, #tpu.memory_space<vmem>>, vector<64x1xf32>
      tpu.vector_store %arg5[%c0_10, %c0_11], %13 {strides = array<i32>} : memref<64x1xf32, #tpu.memory_space<vmem>>, vector<64x1xf32>,
    } else {
    }
    %c0 = arith.constant 0 : index
    %c0_1 = arith.constant 0 : index
    %c0_2 = arith.constant 0 : index
    %3 = vector.load %arg3[%c0, %c0_1, %c0_2] : memref<1x64x256xf32, #tpu.memory_space<vmem>>, vector<1x64x256xf32>
    %4 = vector.shape_cast %3 : vector<1x64x256xf32> to vector<64x256xf32>
    %c0_3 = arith.constant 0 : index
    %c0_4 = arith.constant 0 : index
    %5 = vector.load %arg5[%c0_3, %c0_4] : memref<64x1xf32, #tpu.memory_space<vmem>>, vector<64x1xf32>
    %cst = arith.constant dense<0.000000e+00> : vector<64xf32>
    %6 = vector.multi_reduction <add>, %4, %cst [1] : vector<64x256xf32> to vector<64xf32>
    %7 = vector.shape_cast %6 : vector<64xf32> to vector<64x1xf32>
    %8 = arith.addf %5, %7 : vector<64x1xf32>
    %c0_5 = arith.constant 0 : index
    %c0_6 = arith.constant 0 : index
    %9 = vector.load %arg5[%c0_5, %c0_6] : memref<64x1xf32, #tpu.memory_space<vmem>>, vector<64x1xf32>
    tpu.vector_store %arg5[%c0_5, %c0_6], %8 {strides = array<i32>} : memref<64x1xf32, #tpu.memory_space<vmem>>, vector<64x1xf32>,
    %c0_i32_7 = arith.constant 0 : i32
    %10 = arith.cmpi eq, %arg2, %c0_i32_7 : i32
    %11 = arith.extui %10 : i1 to i32
    %c0_i32_8 = arith.constant 0 : i32
    %12 = arith.cmpi ne, %11, %c0_i32_8 : i32
    scf.if %12 {
      %c0_9 = arith.constant 0 : index
      %c0_10 = arith.constant 0 : index
      %13 = vector.load %arg5[%c0_9, %c0_10] : memref<64x1xf32, #tpu.memory_space<vmem>>, vector<64x1xf32>
      %cst_11 = arith.constant 3.906250e-03 : f32
      %14 = vector.broadcast %cst_11 : f32 to vector<64x1xf32>
      %15 = arith.mulf %13, %14 : vector<64x1xf32>
      %16 = vector.shape_cast %15 : vector<64x1xf32> to vector<1x64x1xf32>
      %c0_12 = arith.constant 0 : index
      %c0_13 = arith.constant 0 : index
      %c0_14 = arith.constant 0 : index
      %17 = vector.load %arg4[%c0_12, %c0_13, %c0_14] : memref<1x64x1xf32, #tpu.memory_space<vmem>>, vector<1x64x1xf32>
      tpu.vector_store %arg4[%c0_12, %c0_13, %c0_14], %16 {strides = array<i32>} : memref<1x64x1xf32, #tpu.memory_space<vmem>>, vector<1x64x1xf32>,
    } else {
    }
    return
  }
  func.func @transform_0(%arg0: i32, %arg1: i32, %arg2: i32) -> (i32, i32, i32) {
    %c0_i32 = arith.constant 0 : i32
    return %arg0, %arg1, %arg2 : i32, i32, i32
  }
  func.func @transform_1(%arg0: i32, %arg1: i32, %arg2: i32) -> (i32, i32, i32) {
    %c0_i32 = arith.constant 0 : i32
    %c0_i32_0 = arith.constant 0 : i32
    return %arg0, %arg1, %c0_i32 : i32, i32, i32
  }
}

</mosaic_0001>

<bundles_post_ra>
// kernel: tpu_custom_call.1
= control target key start
LH: loop header
LB: loop body
LE: loop exit
PB: predicated region body
PF: predicated region fallthrough
CT: control target
= control target key end

     0   :  { %6 = vsyncpa [#allocation4], 0  ;;  %s814_s0 = inlined_call_operand.hbm [shape: f32[2,64,256], index: 0, kind: input, shape index: {}]   ;;  %s815_s1 = inlined_call_operand.hbm [shape: f32[2,64,1], index: 1, kind: output, shape index: {}]  }
   0x1   :  { %8 = vsyncpa [#allocation4 + $0x1], 0 }
   0x2   :  { %9 = vsyncpa [#allocation5], 0 }
   0x3   :  { %11 = vsyncpa [#allocation5 + $0x1], 0  ;;  %s596_s6 = smov 0   ;;  %s598_s7 = smov 0  }
   0x4   :  { %s600_s8 = smov 0   ;;  %s602_s9 = smov 0  }
   0x5   :  { %s604_s10 = smov 0   ;;  %s606_s11 = smov 0  }
   0x6 LB: > { %s381_s12 = sadd.s32 4294967295, %s577_s11   ;;  %s382_s13 = sadd.s32 4294967294, %s577_s11   ;;  %s577_s11 = sphi %s606_s11, %s17_s11   ;;  %s573_s10 = sphi %s604_s10, %s830_s10   ;;  %s569_s9 = sphi %s602_s9, %s829_s9   ;;  %s565_s8 = sphi %s600_s8, %s828_s8   ;;  %s561_s7 = sphi %s598_s7, %s827_s7   ;;  %s557_s6 = sphi %s596_s6, %s826_s6  }
   0x7   : > { %s36_s14 = sadd.s32 1, %s573_s10  ;;  %s47_s15 = sadd.s32 1, %s565_s8 }
   0x8   : > { %p38_p0 = scmp.ge.s32.totalorder %s36_s14, 2  ;;  %p54_p1 = scmp.ne.s32.totalorder %s565_s8, %s561_s7 }
   0x9   : > { %p55_p2 = scmp.eq.s32.totalorder %s577_s11, 0  ;;  %p60_p3 = scmp.ne.s32.totalorder %s561_s7, %s557_s6 }
   0xa   : > { %s832_s14 = smov (%p38_p0, %s36_s14), 0  ;;  %p61_p5 = scmp.eq.s32.totalorder %s381_s12, 0 }
   0xb   : > { %p637_p4 = por %p55_p2, %p54_p1  ;;  %s40_s17 = ssub.s32 %s573_s10, %s832_s14 }
   0xc   : > { %p86_p6 = scmp.eq.s32.totalorder %s381_s12, 1  ;;  %p45_p7 = scmp.eq.s32.totalorder %s40_s17, 0 }
   0xd   : > { %p643_p8 = por %p61_p5, %p60_p3  ;;  %p92_p10 = scmp.eq.s32.totalorder %s382_s13, 1 }
   0xe   : > { %p647_p9 = por %p86_p6, %p54_p1  ;;  %p410_p13 = scmp.lt.s32.totalorder %s577_s11, 2 }
   0xf   : > { %s652_s20 = scalar_select %p45_p7, %s565_s8, %s47_s15  }
  0x10   : > { %s819_s19 = scalar_select %p647_p9, 1, 0 }
  0x11   : > { %p654_p11 = por %p92_p10, %p60_p3  ;;  %s112_s22 = sand.u32 1, %s565_s8  }
  0x12   : > { %s385_s23 = sshll.u32 %s112_s22, 7  ;;  %s396_s24 = sshll.u32 %s573_s10, 11 }
  0x13   : > { %s820_s21 = scalar_select %p654_p11, 1, 0 }
  0x14   : > { %s665_s27 = scalar_lea.hbm %s814_s0, %s396_s24  ;;  %s116_s28 = scalar_lea.vmem [#allocation3], %s385_s23 }
  0x15   : > { %s128_s29 = sshll.u32 %s116_s28, 4  ;;  %p671_p0 = pnand %p410_p13, %p637_p4  ;;  %s667_s29 = int_to_ptr.vmem [resolvable:$true] %s128_s29 }
  0x16   : > { %s676_s2 = scalar_lea.sflag [#allocation4], %s112_s22  ;;  %s465_s3 = scalar_lea.hbm %s665_s27, 2048 }
  0x17   : > { %p466_p2 = scmp.ne.s32.totalorder %s665_s27, %s465_s3  ;;  %p467_p3 = pneg %p671_p0 }
  0x18   : > { %s470_s12 = scalar_lea.hbm %s814_s0, 4096  ;;  %p471_p4 = scmp.lt.u32.totalorder %s665_s27, %s814_s0 }
  0x19   : > { %p468_p5 = pnand %p467_p3, %p466_p2  ;;  %p472_p7 = scmp.lt.u32.totalorder %s470_s12, %s465_s3 }
  0x1a   : > { %p474_p13 = scmp.lt.u32.totalorder %s465_s3, %s665_s27 }
  0x1b   : > { %p469_p6 = pneg %p468_p5  ;;  %p473_p10 = por %p472_p7, %p471_p4 }
  0x1d   : > { %p475_p12 = por %p474_p13, %p473_p10 }
  0x1f   : > { %p476_p1 = pnand %p475_p12, %p469_p6 }
  0x21   : > { %479 = shalt.err (!%p476_p1)
}
  0x22   : > { %s480_s16 = scalar_lea.vmem %s667_s29, 2048  ;;  %s579_s17 = smov [#allocation3]  }
  0x23   : > { %p481_p2 = scmp.ne.s32.totalorder %s667_s29, %s480_s16  ;;  %s485_s22 = sshll.u32 %s579_s17, 4  ;;  %s486_s22 = int_to_ptr.vmem [resolvable:$false] %s485_s22 }
  0x24   : > { %s487_s23 = scalar_lea.vmem %s486_s22, 4096  ;;  %p488_p9 = scmp.lt.s32.totalorder %s667_s29, %s486_s22 }
  0x25   : > { %p483_p5 = pnand %p481_p2, %p467_p3  ;;  %p489_p4 = scmp.lt.s32.totalorder %s487_s23, %s480_s16 }
  0x27   : > { %p484_p11 = pneg %p483_p5  ;;  %p490_p7 = por %p489_p4, %p488_p9 }
  0x29   : > { %p491_p10 = pnand %p490_p7, %p484_p11 }
  0x2b   : > { %494 = shalt.err (!%p491_p10)
}
  0x2c   : > { %s580_s24 = smov 256   ;;  %s581_s25 = smov 16  }
  0x2d   : > { %405 = dma.hbm_to_vmem [thread:$0]  (!%p671_p0), %s665_s27, 2048, %s667_s29, %s676_s2, %s580_s24, %s580_s24, %s581_s25  }
  0x2e   : > { %p136_p12 = scmp.lt.s32.totalorder %s577_s11, 3  ;;  %p822_p1 = scmp.ge.s32.totalorder %s577_s11, 1 }
  0x30   : > { %p137_p3 = pnand %p822_p1, %p136_p12 }
  0x31   : > { %s708_s26 = sand.u32 (!%p137_p3), 1, %s561_s7  }
  0x32   : > { %140 = sbr.rel (%p137_p3) target bundleno = 243 (0xf3), region = 24  ;;  %s389_s28 = sshll.u32 (!%p137_p3), %s708_s26, 7 }
  0x33   : > { %s143_s3 = scalar_lea.sflag (!%p137_p3), [#allocation4], %s708_s26  ;;  %s712_s4 = scalar_lea.vmem (!%p137_p3), [#allocation3], %s389_s28 }
  0x39   : > { %548 = dma.done.wait (%p643_p8), %s143_s3, 2048  }
  0x3a   : > { %550 = vsyncadd (%p643_p8), %s143_s3, 4294965248  ;;  %vm172_vm0 = vcmask 7168   ;;  %v582_v0 = vmov 0.0   ;;  %v185_v1 = vld [vmem:[%s712_s4 + $0x20] sm:$0xff]  ;;  %v186_v2 = vld [vmem:[%s712_s4 + $0x28] sm:$0xff]  ;;  %s390_s18 = sshll.u32 %s708_s26, 6 }
  0x3b   : > { %175 = vst.msk [vmem:[#allocation2 + $0x10] sm:$0xff] %vm172_vm0, %v582_v0  ;;  %173 = vst.msk [vmem:[#allocation2] sm:$0xff] %vm172_vm0, %v582_v0  ;;  %v181_v3 = vld [vmem:[%s712_s4] sm:$0xff]  ;;  %v211_v4 = vadd.f32 %v186_v2, %v185_v1  ;;  %v182_v5 = vld [vmem:[%s712_s4 + $0x8] sm:$0xff]  ;;  %s164_s27 = scalar_lea.vmem [#allocation6], %s390_s18  ;;  %s397_s29 = sshll.u32 %s569_s9, 10 }
  0x3c   : > { %174 = vst.msk [vmem:[#allocation2 + $0x8] sm:$0xff] %vm172_vm0, %v582_v0  ;;  %176 = vst.msk [vmem:[#allocation2 + $0x18] sm:$0xff] %vm172_vm0, %v582_v0  ;;  %v187_v6 = vld [vmem:[%s712_s4 + $0x30] sm:$0xff]  ;;  %v188_v7 = vld [vmem:[%s712_s4 + $0x38] sm:$0xff]  ;;  %v205_v8 = vadd.f32 %v182_v5, %v181_v3  ;;  %s289_s30 = sshll.u32 %s164_s27, 4  ;;  %s761_s12 = scalar_lea.hbm %s815_s1, %s397_s29  ;;  %s763_s30 = int_to_ptr.vmem [resolvable:$true] %s289_s30 }
  0x3d   : > { %177 = vst.msk [vmem:[#allocation2 + $0x20] sm:$0xff] %vm172_vm0, %v582_v0  ;;  %178 = vst.msk [vmem:[#allocation2 + $0x28] sm:$0xff] %vm172_vm0, %v582_v0  ;;  %v183_v9 = vld [vmem:[%s712_s4 + $0x10] sm:$0xff]  ;;  %v184_v10 = vld [vmem:[%s712_s4 + $0x18] sm:$0xff]  ;;  %212 = vadd.xlane.f32.xlu1 %v211_v4  ;;  %v214_v11 = vadd.f32 %v188_v7, %v187_v6  ;;  %s274_s9 = scalar_lea.sflag [#allocation5], %s708_s26  ;;  %s495_s13 = scalar_lea.vmem %s763_s30, 1024 }
  0x3e   : > { %179 = vst.msk [vmem:[#allocation2 + $0x30] sm:$0xff] %vm172_vm0, %v582_v0  ;;  %180 = vst.msk [vmem:[#allocation2 + $0x38] sm:$0xff] %vm172_vm0, %v582_v0  ;;  %206 = vadd.xlane.f32.xlu0 %v205_v8  ;;  %v208_v12 = vadd.f32 %v184_v10, %v183_v9  ;;  %v191_v13 = vld [vmem:[%s712_s4 + $0x50] sm:$0xff]  ;;  %v192_v14 = vld [vmem:[%s712_s4 + $0x58] sm:$0xff]  ;;  %p496_p8 = scmp.ne.s32.totalorder %s763_s30, %s495_s13  ;;  %p823_p9 = scmp.ne.s32.totalorder %s819_s19, 0 }
  0x3f   : > { %v189_v15 = vld [vmem:[%s712_s4 + $0x40] sm:$0xff]  ;;  %v190_v16 = vld [vmem:[%s712_s4 + $0x48] sm:$0xff]  ;;  %v220_v17 = vadd.f32 %v192_v14, %v191_v13  ;;  %v195_v19 = vld [vmem:[%s712_s4 + $0x70] sm:$0xff]  ;;  %s583_s15 = smov [#allocation6]  }
  0x40   : > { %v217_v18 = vadd.f32 %v190_v16, %v189_v15  ;;  %v196_v20 = vld [vmem:[%s712_s4 + $0x78] sm:$0xff]  ;;  %v193_v21 = vld [vmem:[%s712_s4 + $0x60] sm:$0xff]  ;;  %v194_v22 = vld [vmem:[%s712_s4 + $0x68] sm:$0xff]  ;;  %p497_p11 = pnand %p496_p8, %p823_p9  ;;  %s499_s16 = sshll.u32 %s583_s15, 4  ;;  %s500_s16 = int_to_ptr.vmem [resolvable:$false] %s499_s16 }
  0x41   : > { %215 = vadd.xlane.f32.xlu1 %v214_v11  ;;  %v226_v23 = vadd.f32 %v196_v20, %v195_v19  ;;  %v223_v24 = vadd.f32 %v194_v22, %v193_v21  ;;  %s501_s17 = scalar_lea.vmem %s500_s16, 2048  ;;  %p502_p6 = scmp.lt.s32.totalorder %s763_s30, %s500_s16 }
  0x42   : > { %209 = vadd.xlane.f32.xlu0 %v208_v12  ;;  %v199_v25 = vld [vmem:[#allocation2 + $0x10] sm:$0xff]  ;;  %v197_v26 = vld [vmem:[#allocation2] sm:$0xff]  ;;  %p498_p0 = pneg %p497_p11  ;;  %p503_p13 = scmp.lt.s32.totalorder %s501_s17, %s495_s13 }
  0x43   : > { %v200_v31 = vld [vmem:[#allocation2 + $0x18] sm:$0xff]  ;;  %v198_v32 = vld [vmem:[#allocation2 + $0x8] sm:$0xff] }
  0x44   : > { %v202_v37 = vld [vmem:[#allocation2 + $0x28] sm:$0xff]  ;;  %v201_v38 = vld [vmem:[#allocation2 + $0x20] sm:$0xff]  ;;  %p504_p2 = por %p503_p13, %p502_p6 }
  0x45   : > { %221 = vadd.xlane.f32.xlu1 %v220_v17  ;;  %v204_v44 = vld [vmem:[#allocation2 + $0x38] sm:$0xff]  ;;  %v203_v47 = vld [vmem:[#allocation2 + $0x30] sm:$0xff] }
  0x46   : > { %218 = vadd.xlane.f32.xlu0 %v217_v18  ;;  %p505_p5 = pnand %p504_p2, %p498_p0 }
  0x49   : > { %227 = vadd.xlane.f32.xlu1 %v226_v23 }
  0x4a   : > { %224 = vadd.xlane.f32.xlu0 %v223_v24 }
  0xca   : > { %v213_v27 = vpop.xlane.xlu1 %212 }
  0xcb   : > { %v231_v28 = vadd.f32 %v213_v27, %v199_v25  ;;  %v207_v29 = vpop.xlane.xlu0 %206 }
  0xcc   : > { %v229_v30 = vadd.f32 %v207_v29, %v197_v26 }
  0xcd   : > { %240 = vst.msk [vmem:[#allocation2 + $0x10] sm:$0xff] %vm172_vm0, %v231_v28 }
  0xce   : > { %238 = vst.msk [vmem:[#allocation2] sm:$0xff] %vm172_vm0, %v229_v30  ;;  %v216_v33 = vpop.xlane.xlu1 %215 }
  0xcf   : > { %v232_v34 = vadd.f32 %v216_v33, %v200_v31  ;;  %v210_v35 = vpop.xlane.xlu0 %209 }
  0xd0   : > { %v230_v36 = vadd.f32 %v210_v35, %v198_v32 }
  0xd1   : > { %241 = vst.msk [vmem:[#allocation2 + $0x18] sm:$0xff] %vm172_vm0, %v232_v34 }
  0xd2   : > { %239 = vst.msk [vmem:[#allocation2 + $0x8] sm:$0xff] %vm172_vm0, %v230_v36  ;;  %v222_v39 = vpop.xlane.xlu1 %221 }
  0xd3   : > { %v234_v40 = vadd.f32 %v222_v39, %v202_v37  ;;  %v219_v41 = vpop.xlane.xlu0 %218 }
  0xd4   : > { %v251_v42 = vld [vmem:[#allocation2 + $0x10] sm:$0xff]  ;;  %v233_v43 = vadd.f32 %v219_v41, %v201_v38 }
  0xd5   : > { %v259_v45 = vmul.f32 0.00390625, %v251_v42  ;;  %v249_v46 = vld [vmem:[#allocation2] sm:$0xff]  ;;  %243 = vst.msk [vmem:[#allocation2 + $0x28] sm:$0xff] %vm172_vm0, %v234_v40 }
  0xd6   : > { %v257_v48 = vmul.f32 0.00390625, %v249_v46  ;;  %242 = vst.msk [vmem:[#allocation2 + $0x20] sm:$0xff] %vm172_vm0, %v233_v43  ;;  %v228_v49 = vpop.xlane.xlu1 %227 }
  0xd7   : > { %267 = vst.msk [vmem:[%s164_s27 + $0x10] sm:$0xff] %vm172_vm0, %v259_v45  ;;  %v236_v50 = vadd.f32 %v228_v49, %v204_v44  ;;  %v225_v51 = vpop.xlane.xlu0 %224 }
  0xd8   : > { %265 = vst.msk [vmem:[%s164_s27] sm:$0xff] %vm172_vm0, %v257_v48  ;;  %v252_v52 = vld [vmem:[#allocation2 + $0x18] sm:$0xff]  ;;  %v235_v53 = vadd.f32 %v225_v51, %v203_v47 }
  0xd9   : > { %v260_v54 = vmul.f32 0.00390625, %v252_v52  ;;  %v250_v55 = vld [vmem:[#allocation2 + $0x8] sm:$0xff]  ;;  %245 = vst.msk [vmem:[#allocation2 + $0x38] sm:$0xff] %vm172_vm0, %v236_v50 }
  0xda   : > { %v258_v56 = vmul.f32 0.00390625, %v250_v55  ;;  %244 = vst.msk [vmem:[#allocation2 + $0x30] sm:$0xff] %vm172_vm0, %v235_v53 }
  0xdb   : > { %268 = vst.msk [vmem:[%s164_s27 + $0x18] sm:$0xff] %vm172_vm0, %v260_v54 }
  0xdc   : > { %266 = vst.msk [vmem:[%s164_s27 + $0x8] sm:$0xff] %vm172_vm0, %v258_v56  ;;  %v254_v57 = vld [vmem:[#allocation2 + $0x28] sm:$0xff] }
  0xdd   : > { %v262_v58 = vmul.f32 0.00390625, %v254_v57  ;;  %v253_v59 = vld [vmem:[#allocation2 + $0x20] sm:$0xff] }
  0xde   : > { %v261_v60 = vmul.f32 0.00390625, %v253_v59 }
  0xdf   : > { %270 = vst.msk [vmem:[%s164_s27 + $0x28] sm:$0xff] %vm172_vm0, %v262_v58 }
  0xe0   : > { %269 = vst.msk [vmem:[%s164_s27 + $0x20] sm:$0xff] %vm172_vm0, %v261_v60  ;;  %v256_v61 = vld [vmem:[#allocation2 + $0x38] sm:$0xff] }
  0xe1   : > { %v264_v62 = vmul.f32 0.00390625, %v256_v61  ;;  %v255_v63 = vld [vmem:[#allocation2 + $0x30] sm:$0xff] }
  0xe2   : > { %v263_v0 = vmul.f32 0.00390625, %v255_v63 }
  0xe3   : > { %272 = vst.msk [vmem:[%s164_s27 + $0x38] sm:$0xff] %vm172_vm0, %v264_v62 }
  0xe4   : > { %271 = vst.msk [vmem:[%s164_s27 + $0x30] sm:$0xff] %vm172_vm0, %v263_v0 }
  0xe5   : > { %508 = shalt.err (!%p505_p5)
}
  0xe6   : > { %s509_s22 = scalar_lea.hbm %s761_s12, 1024  ;;  %s513_s25 = scalar_lea.hbm %s815_s1, 2048 }
  0xe7   : > { %p510_p4 = scmp.ne.s32.totalorder %s761_s12, %s509_s22  ;;  %p514_p12 = scmp.lt.u32.totalorder %s761_s12, %s815_s1 }
  0xe8   : > { %p515_p1 = scmp.lt.u32.totalorder %s513_s25, %s509_s22  ;;  %p517_p8 = scmp.lt.u32.totalorder %s509_s22, %s761_s12 }
  0xe9   : > { %p511_p7 = pnand %p510_p4, %p823_p9 }
  0xea   : > { %p516_p3 = por %p515_p1, %p514_p12 }
  0xeb   : > { %p512_p10 = pneg %p511_p7 }
  0xec   : > { %p518_p11 = por %p517_p8, %p516_p3 }
  0xee   : > { %p519_p0 = pnand %p518_p11, %p512_p10 }
  0xf0   : > { %522 = shalt.err (!%p519_p0)
}
  0xf1   : > { %s584_s4 = smov 128   ;;  %s585_s18 = smov 8  }
  0xf2   : > { %400 = dma.vmem_to_hbm [thread:$0]  (%p823_p9), %s763_s30, 1024, %s761_s12, %s274_s9, %s584_s4, %s584_s4, %s585_s18  }
  0xf3 PF: > { %s304_s27 = sand.u32 1, %s557_s6   ;;  %p824_p6 = scmp.ne.s32.totalorder %s820_s21, 0 }
  0xf4   : > { %p825_p13 = scmp.ge.s32.totalorder %s577_s11, 2  ;;  %s305_s29 = scalar_lea.sflag [#allocation5], %s304_s27 }
  0xf6   : > { %p407_p2 = pnand %p825_p13, %p824_p6 }
  0xf8   : > { %552 = dma.done.wait (!%p407_p2), %s305_s29, 1024  }
  0xf9   : > { %554 = vsyncadd (!%p407_p2), %s305_s29, 4294966272  ;;  %s17_s11 = sadd.s32 1, %s577_s11   ;;  %s826_s6 = smov %s561_s7 }
  0xfa   : > { %p14_p5 = scmp.ge.s32.totalorder %s17_s11, 4   ;;  %s827_s7 = smov %s565_s8 }
  0xfb   : > { %s828_s8 = smov %s652_s20  ;;  %s829_s9 = smov %s573_s10 }
  0xfc   : > { %s830_s10 = smov %s832_s14  ;;  %16 = sbr.rel (!%p14_p5) target bundleno = 6 (0x6), region = 77 }
 0x103   :  { %310 = vsyncpa [#allocation4], 1 }
 0x104   :  { %312 = vsyncpa [#allocation4 + $0x1], 1 }
 0x105   :  { %313 = vsyncpa [#allocation5], 1 }
 0x106   :  { %315 = vsyncpa [#allocation5 + $0x1], 1 }

</bundles_post_ra>
